<compile_context>
chip_gen: v6e
topology: v6e:2x2x1
jax: 0.10.0
libtpu: 0.0.40
codegen_flags: <defaults>
</compile_context>

<pallas_src>
import jax
import jax.numpy as jnp
from jax import lax
from jax.experimental import pallas as pl
from jax.experimental.pallas import tpu as pltpu


_VMEM_BUDGET = 40 * 1024 * 1024     # total working-set cap (safe on v7x's 64 MiB)
_BLOCK_TARGET = 4 * 1024 * 1024     # target bytes for one logits block


def _round_up(x, m):
    return (x + m - 1) // m * m


def _dense_block_rows(n_rows, c, max_block_rows=None):
    """Rows (of 128 pixels) per block for the dense [N, C, HW/128, 128] layout."""
    c_pad = _round_up(c, 8)
    # x double-buffered + target double-buffered + accumulator, per 128-px row.
    per_row = (2 * c_pad + 2 + 1) * 128 * 4
    rows = min(max(8, _VMEM_BUDGET // per_row // 8 * 8),
               max(8, _BLOCK_TARGET // (c_pad * 128 * 4) // 8 * 8))
    if max_block_rows is not None:
        rows = min(rows, max_block_rows)
    if rows >= n_rows:
        return n_rows                 # full extent (allowed even if not 8-multiple)
    return max(8, rows // 8 * 8)      # partial blocks need an 8-multiple sublane dim


def _lane_tile(hw, c, max_tile=None):
    """Spatial (lane-axis) tile for the fallback [N, C, HW] layout."""
    c_pad = _round_up(c, 8)
    per_col = (2 * c_pad + 2 * 8 + 8) * 4      # x(x2) + t(x2, sublane-padded) + acc
    cap = max(128, _VMEM_BUDGET // per_col // 128 * 128)
    tgt = max(128, _BLOCK_TARGET // (c_pad * 4) // 128 * 128)
    tile = min(cap, tgt)
    if max_tile is not None:
        tile = min(tile, max(128, max_tile // 128 * 128))
    return min(tile, _round_up(hw, 128))


def _vmem_limit(block_bytes):
    return int(min(max(2 * block_bytes + (4 << 20), 32 << 20), 50 << 20))


def focal_loss_adaptive(logits, target, *, max_block_rows=None, max_tile=None):
    """FocalLossAdaptive.forward(input, target) with module defaults
    (normalized=False, alpha=None, gamma=0, reduction='mean').

    logits: float [N, C, *spatial] (f32 or bf16)   target: int [N, *spatial]
    Returns: f32 scalar loss.
    """
    n, c = int(logits.shape[0]), int(logits.shape[1])
    hw = 1
    for d in logits.shape[2:]:
        hw *= int(d)
    if c < 2:
        # TODO(synk): binary (logsigmoid) path for C == 1 not implemented.
        raise NotImplementedError("C == 1 (logsigmoid) path not implemented")

    x3 = logits.reshape(n, c, hw)                       # free reshape, native layout
    t2 = target.reshape(n, hw).astype(jnp.int32)

    # Adaptive-gamma table (defaults gamma=0, {0.2: 5.0, 0.5: 3.0}):
    #   pt >= 0.5 -> w = 1 ; 0.2 <= pt < 0.5 -> w = (1-pt)^3 ; pt < 0.2 -> (1-pt)^5
    use_dense = (hw % 128 == 0) and (c <= 16)

    if use_dense:
        # ---- sublane-dense path: classes unrolled, pixels fill full vregs ----
        n_rows = hw // 128
        rows = _dense_block_rows(n_rows, c, max_block_rows)
        n_blocks = -(-n_rows // rows)
        p_split = 2 if (n == 1 and n_blocks >= 2 and n_blocks % 2 == 0) else 1
        s_blocks = n_blocks // p_split
        needs_mask = (n_rows % rows) != 0

        x4 = x3.reshape(n, c, n_rows, 128)              # free reshape
        t3 = t2.reshape(n, n_rows, 128)

        def kernel(x_ref, t_ref, o_ref, acc_ref):
            p = pl.program_id(1)
            s = pl.program_id(2)

            @pl.when(s == 0)
            def _():
                acc_ref[...] = jnp.zeros_like(acc_ref)

            tgt = t_ref[...]                                         # (rows, 128)
            # Running max over the (small) class axis; each slice is lane/sublane dense.
            m = x_ref[0].astype(jnp.float32)
            for ci in range(1, c):
                m = jnp.maximum(m, x_ref[ci].astype(jnp.float32))
            s_exp = jnp.zeros_like(m)
            x_t = jnp.zeros_like(m)
            e_t = jnp.zeros_like(m)
            for ci in range(c):
                xc = x_ref[ci].astype(jnp.float32)
                e = jnp.exp(xc - m)
                s_exp = s_exp + e
                hit = tgt == ci
                x_t = jnp.where(hit, xc, x_t)
                e_t = jnp.where(hit, e, e_t)
            logpt = x_t - m - jnp.log(s_exp)                         # log_softmax @ target
            pt = e_t / s_exp                                         # reuse exps: no 2nd EUP exp
            u = 1.0 - pt
            u3 = u * u * u
            w = jnp.where(pt >= 0.5, 1.0, jnp.where(pt < 0.2, u3 * u * u, u3))
            loss = -w * logpt
            if needs_mask:
                row = (p * s_blocks + s) * rows + lax.broadcasted_iota(
                    jnp.int32, loss.shape, 0)
                loss = jnp.where(row < n_rows, loss, 0.0)            # ragged tail rows
            acc_ref[...] += loss

            @pl.when(s == pl.num_programs(2) - 1)
            def _():
                o_ref[...] = jnp.sum(acc_ref[...], axis=(0, 1), keepdims=True)

        block_bytes = (2 * _round_up(c, 8) + 3) * rows * 128 * 4
        partials = pl.pallas_call(
            kernel,
            out_shape=jax.ShapeDtypeStruct((n, p_split, 1, 1), jnp.float32),
            grid_spec=pltpu.PrefetchScalarGridSpec(
                num_scalar_prefetch=0,
                grid=(n, p_split, s_blocks),
                in_specs=[
                    pl.BlockSpec((None, c, rows, 128),
                                 lambda i, p, s: (i, 0, p * s_blocks + s, 0)),
                    pl.BlockSpec((None, rows, 128),
                                 lambda i, p, s: (i, p * s_blocks + s, 0)),
                ],
                out_specs=pl.BlockSpec((None, None, 1, 1),
                                       lambda i, p, s: (i, p, 0, 0)),
                scratch_shapes=[pltpu.VMEM((rows, 128), jnp.float32)],
            ),
            compiler_params=pltpu.CompilerParams(
                dimension_semantics=("parallel", "parallel", "arbitrary"),
                vmem_limit_bytes=_vmem_limit(block_bytes),
            ),
        )(x4, t3)

    else:
        # ---- fallback: classes on sublanes, pixels on lanes (any hw, any C) ----
        tile = _lane_tile(hw, c, max_tile)
        n_blocks = -(-hw // tile)
        p_split = 2 if (n == 1 and n_blocks >= 2 and n_blocks % 2 == 0) else 1
        s_blocks = n_blocks // p_split
        needs_mask = (hw % tile) != 0

        t3 = t2.reshape(n, 1, hw)

        def kernel(x_ref, t_ref, o_ref, acc_ref):
            p = pl.program_id(1)
            s = pl.program_id(2)

            @pl.when(s == 0)
            def _():
                acc_ref[...] = jnp.zeros_like(acc_ref)

            x = x_ref[...].astype(jnp.float32)                       # (C, tile)
            tgt = t_ref[...]                                         # (1, tile)
            m = jnp.max(x, axis=0, keepdims=True)
            e = jnp.exp(x - m)
            s_exp = jnp.sum(e, axis=0, keepdims=True)
            cls = lax.broadcasted_iota(jnp.int32, x.shape, 0)
            hit = cls == tgt
            x_t = jnp.sum(jnp.where(hit, x, 0.0), axis=0, keepdims=True)
            e_t = jnp.sum(jnp.where(hit, e, 0.0), axis=0, keepdims=True)
            logpt = x_t - m - jnp.log(s_exp)
            pt = e_t / s_exp
            u = 1.0 - pt
            u3 = u * u * u
            w = jnp.where(pt >= 0.5, 1.0, jnp.where(pt < 0.2, u3 * u * u, u3))
            loss = -w * logpt
            if needs_mask:
                col = (p * s_blocks + s) * tile + lax.broadcasted_iota(
                    jnp.int32, loss.shape, 1)
                loss = jnp.where(col < hw, loss, 0.0)                # ragged tail columns
            acc_ref[...] += loss

            @pl.when(s == pl.num_programs(2) - 1)
            def _():
                o_ref[...] = jnp.sum(acc_ref[...], axis=1, keepdims=True)

        block_bytes = (2 * _round_up(c, 8) + 3 * 8) * tile * 4
        partials = pl.pallas_call(
            kernel,
            out_shape=jax.ShapeDtypeStruct((n, p_split, 1, 1), jnp.float32),
            grid_spec=pltpu.PrefetchScalarGridSpec(
                num_scalar_prefetch=0,
                grid=(n, p_split, s_blocks),
                in_specs=[
                    pl.BlockSpec((None, c, tile),
                                 lambda i, p, s: (i, 0, p * s_blocks + s)),
                    pl.BlockSpec((None, 1, tile),
                                 lambda i, p, s: (i, 0, p * s_blocks + s)),
                ],
                out_specs=pl.BlockSpec((None, None, 1, 1),
                                       lambda i, p, s: (i, p, 0, 0)),
                scratch_shapes=[pltpu.VMEM((1, tile), jnp.float32)],
            ),
            compiler_params=pltpu.CompilerParams(
                dimension_semantics=("parallel", "parallel", "arbitrary"),
                vmem_limit_bytes=_vmem_limit(block_bytes),
            ),
        )(x3, t3)

    # reduction='mean' over the true element count.
    return jnp.sum(partials) / jnp.float32(n * hw)


def _focal_loss_reference(logits_nchw, target_nhw):
    """Pure-JAX reference mirroring the PyTorch forward."""
    n, c = logits_nchw.shape[0], logits_nchw.shape[1]
    x = jnp.moveaxis(logits_nchw.reshape(n, c, -1), 1, 2).reshape(-1, c)
    x = x.astype(jnp.float32)
    t = target_nhw.reshape(-1).astype(jnp.int32)
    logp = jax.nn.log_softmax(x, axis=-1)
    logpt = jnp.take_along_axis(logp, t[:, None], axis=1)[:, 0]
    pt = jnp.exp(logpt)
    gamma = jnp.where(pt >= 0.5, 0.0, jnp.where(pt < 0.2, 5.0, 3.0))
    loss = -jnp.power(1.0 - pt, gamma) * logpt
    return jnp.mean(loss)


if __name__ == "__main__":
    base_key = jax.random.PRNGKey(0)

    def run_case(n, c, h, w, **kw):
        k1, k2 = jax.random.split(jax.random.fold_in(base_key, n * 10000 + c * 100 + h))
        logits = jax.random.normal(k1, (n, c, h, w), dtype=jnp.float32) * 3.0
        target = jax.random.randint(k2, (n, h, w), 0, c, dtype=jnp.int32)
        loss = jax.block_until_ready(focal_loss_adaptive(logits, target, **kw))
        ref = jax.block_until_ready(_focal_loss_reference(logits, target))
        assert jnp.allclose(loss, ref, rtol=1e-5, atol=1e-5), (n, c, h, w, loss, ref)

    # Primary small demo: dense (128-multiple spatial) path.
    run_case(2, 4, 16, 16)
    # N == 1 megacore split + ragged dense tail block (forced small block_rows).
    run_case(1, 4, 32, 40, max_block_rows=8)
    # Non-128-multiple spatial size -> lane-layout fallback with in-kernel tail mask.
    run_case(2, 5, 10, 10)

    print("KERNEL_OK")
</pallas_src>

<mosaic_0001>
module attributes {stable_mosaic.version = 11 : i64} {
  func.func @kernel(%arg0: i32, %arg1: i32, %arg2: i32, %arg3: memref<1x4x2x128xf32, #tpu.memory_space<vmem>>, %arg4: memref<1x2x128xi32, #tpu.memory_space<vmem>>, %arg5: memref<1x1x1x1xf32, #tpu.memory_space<vmem>>, %arg6: memref<2x128xf32, #tpu.memory_space<vmem>>) attributes {dimension_semantics = [#tpu.dimension_semantics<parallel>, #tpu.dimension_semantics<parallel>, #tpu.dimension_semantics<arbitrary>], iteration_bounds = array<i64: 2, 1, 1>, scalar_prefetch = 0 : i64, scratch_operands = 1 : i64, tpu.core_type = #tpu.core_type<tc>, window_params = [{transform_indices = @transform_0, window_bounds = array<i64: 1, 4, 2, 128>}, {transform_indices = @transform_1, window_bounds = array<i64: 1, 2, 128>}, {transform_indices = @transform_2, window_bounds = array<i64: 1, 1, 1, 1>}]} {
    %c0_i32 = arith.constant 0 : i32
    %0 = arith.cmpi eq, %arg2, %c0_i32 : i32
    %1 = arith.extui %0 : i1 to i32
    %c0_i32_0 = arith.constant 0 : i32
    %2 = arith.cmpi ne, %1, %c0_i32_0 : i32
    scf.if %2 {
      %cst_46 = arith.constant 0.000000e+00 : f32
      %81 = vector.broadcast %cst_46 : f32 to vector<2x128xf32>
      %c0_47 = arith.constant 0 : index
      %c0_48 = arith.constant 0 : index
      %82 = vector.load %arg6[%c0_47, %c0_48] : memref<2x128xf32, #tpu.memory_space<vmem>>, vector<2x128xf32>
      tpu.vector_store %arg6[%c0_47, %c0_48], %81 {strides = array<i32>} : memref<2x128xf32, #tpu.memory_space<vmem>>, vector<2x128xf32>,
    } else {
    }
    %c0 = arith.constant 0 : index
    %c0_1 = arith.constant 0 : index
    %c0_2 = arith.constant 0 : index
    %3 = vector.load %arg4[%c0, %c0_1, %c0_2] : memref<1x2x128xi32, #tpu.memory_space<vmem>>, vector<1x2x128xi32>
    %4 = vector.shape_cast %3 : vector<1x2x128xi32> to vector<2x128xi32>
    %c0_3 = arith.constant 0 : index
    %c0_4 = arith.constant 0 : index
    %c0_5 = arith.constant 0 : index
    %c0_6 = arith.constant 0 : index
    %5 = vector.load %arg3[%c0_3, %c0_4, %c0_5, %c0_6] : memref<1x4x2x128xf32, #tpu.memory_space<vmem>>, vector<1x1x2x128xf32>
    %6 = vector.shape_cast %5 : vector<1x1x2x128xf32> to vector<2x128xf32>
    %c0_7 = arith.constant 0 : index
    %c1 = arith.constant 1 : index
    %c0_8 = arith.constant 0 : index
    %c0_9 = arith.constant 0 : index
    %7 = vector.load %arg3[%c0_7, %c1, %c0_8, %c0_9] : memref<1x4x2x128xf32, #tpu.memory_space<vmem>>, vector<1x1x2x128xf32>
    %8 = vector.shape_cast %7 : vector<1x1x2x128xf32> to vector<2x128xf32>
    %9 = arith.maximumf %6, %8 : vector<2x128xf32>
    %c0_10 = arith.constant 0 : index
    %c2 = arith.constant 2 : index
    %c0_11 = arith.constant 0 : index
    %c0_12 = arith.constant 0 : index
    %10 = vector.load %arg3[%c0_10, %c2, %c0_11, %c0_12] : memref<1x4x2x128xf32, #tpu.memory_space<vmem>>, vector<1x1x2x128xf32>
    %11 = vector.shape_cast %10 : vector<1x1x2x128xf32> to vector<2x128xf32>
    %12 = arith.maximumf %9, %11 : vector<2x128xf32>
    %c0_13 = arith.constant 0 : index
    %c3 = arith.constant 3 : index
    %c0_14 = arith.constant 0 : index
    %c0_15 = arith.constant 0 : index
    %13 = vector.load %arg3[%c0_13, %c3, %c0_14, %c0_15] : memref<1x4x2x128xf32, #tpu.memory_space<vmem>>, vector<1x1x2x128xf32>
    %14 = vector.shape_cast %13 : vector<1x1x2x128xf32> to vector<2x128xf32>
    %15 = arith.maximumf %12, %14 : vector<2x128xf32>
    %cst = arith.constant 0.000000e+00 : f32
    %16 = vector.broadcast %cst : f32 to vector<2x128xf32>
    %cst_16 = arith.constant 0.000000e+00 : f32
    %17 = vector.broadcast %cst_16 : f32 to vector<2x128xf32>
    %cst_17 = arith.constant 0.000000e+00 : f32
    %18 = vector.broadcast %cst_17 : f32 to vector<2x128xf32>
    %c0_18 = arith.constant 0 : index
    %c0_19 = arith.constant 0 : index
    %c0_20 = arith.constant 0 : index
    %c0_21 = arith.constant 0 : index
    %19 = vector.load %arg3[%c0_18, %c0_19, %c0_20, %c0_21] : memref<1x4x2x128xf32, #tpu.memory_space<vmem>>, vector<1x1x2x128xf32>
    %20 = vector.shape_cast %19 : vector<1x1x2x128xf32> to vector<2x128xf32>
    %21 = arith.subf %20, %15 : vector<2x128xf32>
    %22 = math.exp %21 : vector<2x128xf32>
    %23 = arith.addf %16, %22 : vector<2x128xf32>
    %c0_i32_22 = arith.constant 0 : i32
    %24 = vector.broadcast %c0_i32_22 : i32 to vector<2x128xi32>
    %25 = arith.cmpi eq, %4, %24 : vector<2x128xi32>
    %26 = arith.select %25, %20, %17 : vector<2x128xi1>, vector<2x128xf32>
    %27 = arith.select %25, %22, %18 : vector<2x128xi1>, vector<2x128xf32>
    %c0_23 = arith.constant 0 : index
    %c1_24 = arith.constant 1 : index
    %c0_25 = arith.constant 0 : index
    %c0_26 = arith.constant 0 : index
    %28 = vector.load %arg3[%c0_23, %c1_24, %c0_25, %c0_26] : memref<1x4x2x128xf32, #tpu.memory_space<vmem>>, vector<1x1x2x128xf32>
    %29 = vector.shape_cast %28 : vector<1x1x2x128xf32> to vector<2x128xf32>
    %30 = arith.subf %29, %15 : vector<2x128xf32>
    %31 = math.exp %30 : vector<2x128xf32>
    %32 = arith.addf %23, %31 : vector<2x128xf32>
    %c1_i32 = arith.constant 1 : i32
    %33 = vector.broadcast %c1_i32 : i32 to vector<2x128xi32>
    %34 = arith.cmpi eq, %4, %33 : vector<2x128xi32>
    %35 = arith.select %34, %29, %26 : vector<2x128xi1>, vector<2x128xf32>
    %36 = arith.select %34, %31, %27 : vector<2x128xi1>, vector<2x128xf32>
    %c0_27 = arith.constant 0 : index
    %c2_28 = arith.constant 2 : index
    %c0_29 = arith.constant 0 : index
    %c0_30 = arith.constant 0 : index
    %37 = vector.load %arg3[%c0_27, %c2_28, %c0_29, %c0_30] : memref<1x4x2x128xf32, #tpu.memory_space<vmem>>, vector<1x1x2x128xf32>
    %38 = vector.shape_cast %37 : vector<1x1x2x128xf32> to vector<2x128xf32>
    %39 = arith.subf %38, %15 : vector<2x128xf32>
    %40 = math.exp %39 : vector<2x128xf32>
    %41 = arith.addf %32, %40 : vector<2x128xf32>
    %c2_i32 = arith.constant 2 : i32
    %42 = vector.broadcast %c2_i32 : i32 to vector<2x128xi32>
    %43 = arith.cmpi eq, %4, %42 : vector<2x128xi32>
    %44 = arith.select %43, %38, %35 : vector<2x128xi1>, vector<2x128xf32>
    %45 = arith.select %43, %40, %36 : vector<2x128xi1>, vector<2x128xf32>
    %c0_31 = arith.constant 0 : index
    %c3_32 = arith.constant 3 : index
    %c0_33 = arith.constant 0 : index
    %c0_34 = arith.constant 0 : index
    %46 = vector.load %arg3[%c0_31, %c3_32, %c0_33, %c0_34] : memref<1x4x2x128xf32, #tpu.memory_space<vmem>>, vector<1x1x2x128xf32>
    %47 = vector.shape_cast %46 : vector<1x1x2x128xf32> to vector<2x128xf32>
    %48 = arith.subf %47, %15 : vector<2x128xf32>
    %49 = math.exp %48 : vector<2x128xf32>
    %50 = arith.addf %41, %49 : vector<2x128xf32>
    %c3_i32 = arith.constant 3 : i32
    %51 = vector.broadcast %c3_i32 : i32 to vector<2x128xi32>
    %52 = arith.cmpi eq, %4, %51 : vector<2x128xi32>
    %53 = arith.select %52, %47, %44 : vector<2x128xi1>, vector<2x128xf32>
    %54 = arith.select %52, %49, %45 : vector<2x128xi1>, vector<2x128xf32>
    %55 = arith.subf %53, %15 : vector<2x128xf32>
    %56 = math.log %50 : vector<2x128xf32>
    %57 = arith.subf %55, %56 : vector<2x128xf32>
    %58 = arith.divf %54, %50 : vector<2x128xf32>
    %cst_35 = arith.constant 1.000000e+00 : f32
    %59 = vector.broadcast %cst_35 : f32 to vector<2x128xf32>
    %60 = arith.subf %59, %58 : vector<2x128xf32>
    %61 = arith.mulf %60, %60 : vector<2x128xf32>
    %62 = arith.mulf %61, %60 : vector<2x128xf32>
    %cst_36 = arith.constant 5.000000e-01 : f32
    %63 = vector.broadcast %cst_36 : f32 to vector<2x128xf32>
    %64 = arith.cmpf oge, %58, %63 : vector<2x128xf32>
    %cst_37 = arith.constant 2.000000e-01 : f32
    %65 = vector.broadcast %cst_37 : f32 to vector<2x128xf32>
    %66 = arith.cmpf olt, %58, %65 : vector<2x128xf32>
    %67 = arith.mulf %62, %60 : vector<2x128xf32>
    %68 = arith.mulf %67, %60 : vector<2x128xf32>
    %69 = arith.select %66, %68, %62 : vector<2x128xi1>, vector<2x128xf32>
    %cst_38 = arith.constant 1.000000e+00 : f32
    %70 = vector.broadcast %cst_38 : f32 to vector<2x128xf32>
    %71 = arith.select %64, %70, %69 : vector<2x128xi1>, vector<2x128xf32>
    %cst_39 = arith.constant 0.000000e+00 : f32
    %72 = vector.broadcast %cst_39 : f32 to vector<2x128xf32>
    %73 = arith.subf %72, %71 : vector<2x128xf32>
    %74 = arith.mulf %73, %57 : vector<2x128xf32>
    %c0_40 = arith.constant 0 : index
    %c0_41 = arith.constant 0 : index
    %75 = vector.load %arg6[%c0_40, %c0_41] : memref<2x128xf32, #tpu.memory_space<vmem>>, vector<2x128xf32>
    %76 = arith.addf %75, %74 : vector<2x128xf32>
    %c0_42 = arith.constant 0 : index
    %c0_43 = arith.constant 0 : index
    %77 = vector.load %arg6[%c0_42, %c0_43] : memref<2x128xf32, #tpu.memory_space<vmem>>, vector<2x128xf32>
    tpu.vector_store %arg6[%c0_42, %c0_43], %76 {strides = array<i32>} : memref<2x128xf32, #tpu.memory_space<vmem>>, vector<2x128xf32>,
    %c0_i32_44 = arith.constant 0 : i32
    %78 = arith.cmpi eq, %arg2, %c0_i32_44 : i32
    %79 = arith.extui %78 : i1 to i32
    %c0_i32_45 = arith.constant 0 : i32
    %80 = arith.cmpi ne, %79, %c0_i32_45 : i32
    scf.if %80 {
      %c0_46 = arith.constant 0 : index
      %c0_47 = arith.constant 0 : index
      %81 = vector.load %arg6[%c0_46, %c0_47] : memref<2x128xf32, #tpu.memory_space<vmem>>, vector<2x128xf32>
      %82 = vector.shape_cast %81 : vector<2x128xf32> to vector<1x2x128xf32>
      %cst_48 = arith.constant dense<0.000000e+00> : vector<1xf32>
      %83 = vector.multi_reduction <add>, %82, %cst_48 [1, 2] : vector<1x2x128xf32> to vector<1xf32>
      %84 = vector.shape_cast %83 : vector<1xf32> to vector<1x1x1xf32>
      %85 = vector.extract %84[0, 0, 0] : f32 from vector<1x1x1xf32>
      %86 = vector.broadcast %85 : f32 to vector<1x1xf32>
      %c0_49 = arith.constant 0 : index
      %c0_50 = arith.constant 0 : index
      %c0_51 = arith.constant 0 : index
      %c0_52 = arith.constant 0 : index
      %87 = vector.load %arg5[%c0_49, %c0_50, %c0_51, %c0_52] : memref<1x1x1x1xf32, #tpu.memory_space<vmem>>, vector<1x1x1x1xf32>
      %88 = vector.shape_cast %87 : vector<1x1x1x1xf32> to vector<1x1xf32>
      %89 = vector.shape_cast %86 : vector<1x1xf32> to vector<1x1x1x1xf32>
      tpu.vector_store %arg5[%c0_49, %c0_50, %c0_51, %c0_52], %89 {strides = array<i32>} : memref<1x1x1x1xf32, #tpu.memory_space<vmem>>, vector<1x1x1x1xf32>,
    } else {
    }
    return
  }
  func.func @transform_0(%arg0: i32, %arg1: i32, %arg2: i32) -> (i32, i32, i32, i32) {
    %c1_i32 = arith.constant 1 : i32
    %0 = arith.muli %arg1, %c1_i32 : i32
    %1 = arith.addi %0, %arg2 : i32
    %c0_i32 = arith.constant 0 : i32
    %c0_i32_0 = arith.constant 0 : i32
    %c0_i32_1 = arith.constant 0 : i32
    return %arg0, %c0_i32, %1, %c0_i32_0 : i32, i32, i32, i32
  }
  func.func @transform_1(%arg0: i32, %arg1: i32, %arg2: i32) -> (i32, i32, i32) {
    %c1_i32 = arith.constant 1 : i32
    %0 = arith.muli %arg1, %c1_i32 : i32
    %1 = arith.addi %0, %arg2 : i32
    %c0_i32 = arith.constant 0 : i32
    %c0_i32_0 = arith.constant 0 : i32
    return %arg0, %1, %c0_i32 : i32, i32, i32
  }
  func.func @transform_2(%arg0: i32, %arg1: i32, %arg2: i32) -> (i32, i32, i32, i32) {
    %c0_i32 = arith.constant 0 : i32
    %c0_i32_0 = arith.constant 0 : i32
    %c0_i32_1 = arith.constant 0 : i32
    return %arg0, %arg1, %c0_i32, %c0_i32_0 : i32, i32, i32, i32
  }
}

</mosaic_0001>

<bundles_post_ra>
// kernel: tpu_custom_call.1
= control target key start
LH: loop header
LB: loop body
LE: loop exit
PB: predicated region body
PF: predicated region fallthrough
CT: control target
= control target key end

     0   :  { %7 = vsyncpa [#allocation4], 0  ;;  %s779_s0 = inlined_call_operand.hbm [shape: f32[2,4,2,128], index: 0, kind: input, shape index: {}]   ;;  %s780_s1 = inlined_call_operand.hbm [shape: s32[2,2,128], index: 1, kind: input, shape index: {}]   ;;  %s781_s2 = inlined_call_operand.vmem [shape: f32[2,1,1,1], index: 2, kind: output, shape index: {}]  }
   0x1   :  { %9 = vsyncpa [#allocation4 + $0x1], 0 }
   0x2   :  { %10 = vsyncpa [#allocation6], 0 }
   0x3   :  { %12 = vsyncpa [#allocation6 + $0x1], 0  ;;  %s655_s9 = smov 0   ;;  %s657_s10 = smov 0  }
   0x4   :  { %s659_s11 = smov 0   ;;  %s661_s12 = smov 0  }
   0x5   :  { %s663_s13 = smov 0   ;;  %s665_s14 = smov 0  }
   0x6 LB: > { %s428_s15 = sadd.s32 4294967295, %s633_s14   ;;  %s37_s16 = sadd.s32 1, %s629_s13  ;;  %s633_s14 = sphi %s665_s14, %s18_s14   ;;  %s629_s13 = sphi %s663_s13, %s790_s13   ;;  %s625_s12 = sphi %s661_s12, %s789_s12   ;;  %s621_s11 = sphi %s659_s11, %s788_s11   ;;  %s617_s10 = sphi %s657_s10, %s787_s10   ;;  %s613_s9 = sphi %s655_s9, %s786_s9  }
   0x7   : > { %p39_p0 = scmp.ge.s32.totalorder %s37_s16, 2  ;;  %s48_s17 = sadd.s32 1, %s621_s11 }
   0x8   : > { %p55_p1 = scmp.ne.s32.totalorder %s621_s11, %s617_s10  ;;  %p56_p2 = scmp.eq.s32.totalorder %s633_s14, 0 }
   0x9   : > { %s792_s16 = smov (%p39_p0, %s37_s16), 0  ;;  %p61_p4 = scmp.ne.s32.totalorder %s617_s10, %s613_s9 }
   0xa   : > { %p691_p3 = por %p56_p2, %p55_p1  ;;  %s43_s19 = ssub.s32 %s629_s13, %s792_s16 }
   0xb   : > { %p62_p5 = scmp.eq.s32.totalorder %s428_s15, 0  ;;  %p46_p6 = scmp.eq.s32.totalorder %s43_s19, 0 }
   0xc   : > { %p459_p8 = scmp.lt.s32.totalorder %s633_s14, 2  ;;  %s707_s22 = sand.u32 1, %s621_s11  }
   0xd   : > { %p698_p7 = por %p62_p5, %p61_p4  ;;  %s445_s23 = sshll.u32 %s629_s13, 7 }
   0xe   : > { %s704_s21 = scalar_select %p46_p6, %s621_s11, %s48_s17  }
   0xf   : > { %s432_s24 = sshll.u32 %s707_s22, 3  ;;  %s155_s27 = scalar_lea.hbm %s779_s0, %s445_s23 }
  0x10   : > { %s147_s28 = scalar_lea.vmem [#allocation3], %s432_s24  ;;  %p716_p9 = pnand %p459_p8, %p691_p3 }
  0x11   : > { %s156_s29 = sshll.u32 %s147_s28, 4  ;;  %s144_s3 = scalar_lea.sflag [#allocation4], %s707_s22  ;;  %s157_s29 = int_to_ptr.vmem [resolvable:$true] %s156_s29 }
  0x12   : > { %p525_p10 = pneg %p716_p9  ;;  %s536_s4 = scalar_lea.vmem %s157_s29, 128 }
  0x13   : > { %p537_p11 = scmp.ne.s32.totalorder %s157_s29, %s536_s4  ;;  %s635_s5 = smov [#allocation3]  }
  0x14   : > { %s541_s6 = sshll.u32 %s635_s5, 4  ;;  %s542_s6 = int_to_ptr.vmem [resolvable:$false] %s541_s6 }
  0x15   : > { %p539_p12 = pnand %p537_p11, %p525_p10  ;;  %s543_s7 = scalar_lea.vmem %s542_s6, 256 }
  0x16   : > { %p544_p0 = scmp.lt.s32.totalorder %s157_s29, %s542_s6  ;;  %p545_p1 = scmp.lt.s32.totalorder %s543_s7, %s536_s4 }
  0x17   : > { %p540_p13 = pneg %p539_p12 }
  0x18   : > { %p546_p2 = por %p545_p1, %p544_p0 }
  0x1a   : > { %p547_p3 = pnand %p546_p2, %p540_p13 }
  0x1c   : > { %550 = shalt.err (!%p547_p3)
}
  0x1d   : > { %s636_s8 = smov 32   ;;  %s637_s9 = smov 2  }
  0x1e   : > { %455 = dma.hbm_to_vmem [thread:$0]  (!%p716_p9), %s155_s27, 128, %s157_s29, %s144_s3, %s636_s8, %s636_s8, %s637_s9  }
  0x1f   : > { %p437_p4 = scmp.ge.s32.totalorder %s633_s14, 1  ;;  %p184_p5 = scmp.lt.s32.totalorder %s633_s14, 3 }
  0x20   : > { %s435_s15 = sshll.u32 %s707_s22, 1  ;;  %s436_s18 = sshll.u32 %s629_s13, 5 }
  0x21   : > { %p731_p6 = pnand %p437_p4, %p184_p5  ;;  %s170_s19 = scalar_lea.vmem [#allocation5], %s435_s15 }
  0x22   : > { %s179_s23 = sshll.u32 %s170_s19, 4  ;;  %s177_s26 = scalar_lea.hbm %s780_s1, %s436_s18  ;;  %s180_s23 = int_to_ptr.vmem [resolvable:$true] %s179_s23 }
  0x23   : > { %s167_s28 = scalar_lea.sflag [#allocation6], %s707_s22  ;;  %s564_s4 = scalar_lea.vmem %s180_s23, 32 }
  0x24   : > { %p565_p8 = scmp.ne.s32.totalorder %s180_s23, %s564_s4  ;;  %s638_s27 = smov [#allocation5]  }
  0x25   : > { %s569_s29 = sshll.u32 %s638_s27, 4  ;;  %s570_s29 = int_to_ptr.vmem [resolvable:$false] %s569_s29 }
  0x26   : > { %p567_p11 = pnand %p565_p8, %p525_p10  ;;  %s571_s3 = scalar_lea.vmem %s570_s29, 64 }
  0x27   : > { %p572_p13 = scmp.lt.s32.totalorder %s180_s23, %s570_s29  ;;  %p573_p0 = scmp.lt.s32.totalorder %s571_s3, %s564_s4 }
  0x28   : > { %p568_p12 = pneg %p567_p11 }
  0x29   : > { %p574_p1 = por %p573_p0, %p572_p13 }
  0x2b   : > { %p575_p2 = pnand %p574_p1, %p568_p12 }
  0x2d   : > { %578 = shalt.err (!%p575_p2)
}
  0x2e   : > { %458 = dma.hbm_to_vmem [thread:$0]  (!%p716_p9), %s177_s26, 32, %s180_s23, %s167_s28  }
  0x2f   : > { %188 = sbr.rel (%p731_p6) target bundleno = 333 (0x14d), region = 28  ;;  %s190_s22 = sand.u32 (!%p731_p6), 1, %s617_s10  }
  0x30   : > { %s438_s5 = sshll.u32 (!%p731_p6), %s190_s22, 3  ;;  %s191_s6 = scalar_lea.sflag (!%p731_p6), [#allocation4], %s190_s22 }
  0x31   : > { %s194_s7 = scalar_lea.vmem (!%p731_p6), [#allocation3], %s438_s5 }
  0x34   : > { %604 = dma.done.wait (%p698_p7), %s191_s6, 128  }
  0x35   : > { %606 = vsyncadd (%p698_p7), %s191_s6, 4294967168  ;;  %s439_s8 = sshll.u32 %s190_s22, 1  ;;  %s200_s9 = scalar_lea.sflag [#allocation6], %s190_s22 }
  0x36   : > { %s203_s15 = scalar_lea.vmem [#allocation5], %s439_s8 }
  0x37   : > { %608 = dma.done.wait (%p698_p7), %s200_s9, 32  }
  0x38   : > { %610 = vsyncadd (%p698_p7), %s200_s9, 4294967264  ;;  %v639_v0 = vmov 0.0   ;;  %v244_v1 = vld [vmem:[%s194_s7] sm:$0x3]  ;;  %v440_v2 = vld [vmem:[%s194_s7 + $0x2] sm:$0x3] }
  0x39   : > { %242 = vst [vmem:[#allocation2] sm:$0x3] %v639_v0  ;;  %v247_v3 = vmax.f32 %v244_v1, %v440_v2  ;;  %v441_v4 = vld [vmem:[%s194_s7 + $0x4] sm:$0x3]  ;;  %v442_v5 = vld [vmem:[%s194_s7 + $0x6] sm:$0x3] }
  0x3a   : > { %v243_v22 = vld [vmem:[%s203_s15] sm:$0x3]  ;;  %vm306_vm6 = vcmask 1041408   ;;  %p232_p7 = scmp.lt.s32.totalorder %s625_s12, 1  ;;  %vm318_vm7 = vcmask 0  }
  0x3b   : > { %v250_v6 = vmax.f32 %v247_v3, %v441_v4  ;;  %vm258_vm0 = vcmp.eq.s32.totalorder %v243_v22, 0  ;;  %vm265_vm1 = vcmp.eq.s32.totalorder %v243_v22, 1  ;;  %vm272_vm2 = vcmp.eq.s32.totalorder %v243_v22, 2 }
  0x3c   : > { %vm279_vm3 = vcmp.eq.s32.totalorder %v243_v22, 3  ;;  %v259_v27 = vsel %vm258_vm0, %v244_v1, 0.0  ;;  %s794_s12 = smov (!%p232_p7, %s625_s12), 1 }
  0x3d   : > { %v253_v7 = vmax.f32 %v250_v6, %v442_v5  ;;  %v266_v30 = vsel %vm265_vm1, %v440_v2, %v259_v27  ;;  %s237_s17 = scalar_lea.vmem %s781_s2, %s794_s12 }
  0x3e   : > { %v273_v32 = vsel %vm272_vm2, %v441_v4, %v266_v30 }
  0x3f   : > { %v254_v8 = vsub.f32 %v244_v1, %v253_v7  ;;  %v261_v9 = vsub.f32 %v440_v2, %v253_v7  ;;  %v268_v10 = vsub.f32 %v441_v4, %v253_v7  ;;  %v275_v11 = vsub.f32 %v442_v5, %v253_v7 }
  0x40   : > { %v280_v36 = vsel %vm279_vm3, %v442_v5, %v273_v32  ;;  %v299_v46 = vld [vmem:[#allocation2] sm:$0x3] }
  0x41   : > { %v255_v12 = vmul.f32 1.442695, %v254_v8  ;;  %v262_v13 = vmul.f32 1.442695, %v261_v9  ;;  %v269_v14 = vmul.f32 1.442695, %v268_v10  ;;  %v282_v38 = vsub.f32 %v280_v36, %v253_v7 }
  0x42   : > { %v276_v15 = vmul.f32 1.442695, %v275_v11 }
  0x43   : > { %511 = vpow2.f32 %v255_v12 }
  0x44   : > { %513 = vpow2.f32 %v262_v13 }
  0x45   : > { %515 = vpow2.f32 %v269_v14 }
  0x46   : > { %517 = vpow2.f32 %v276_v15 }
  0x50   : > { %v512_v16 = vpop.eup %511 }
  0x51   : > { %v514_v17 = vpop.eup %513  ;;  %v260_v24 = vsel %vm258_vm0, %v512_v16, 0.0 }
  0x52   : > { %v516_v18 = vpop.eup %515  ;;  %v264_v19 = vadd.f32 %v514_v17, %v512_v16  ;;  %v267_v25 = vsel %vm265_vm1, %v514_v17, %v260_v24 }
  0x53   : > { %v518_v20 = vpop.eup %517  ;;  %v274_v26 = vsel %vm272_vm2, %v516_v18, %v267_v25 }
  0x54   : > { %v271_v21 = vadd.f32 %v516_v18, %v264_v19  ;;  %v281_v28 = vsel %vm279_vm3, %v518_v20, %v274_v26 }
  0x56   : > { %v278_v23 = vadd.f32 %v518_v20, %v271_v21 }
  0x58   : > { %519 = vrcp.f32 %v278_v23 }
  0x59   : > { %521 = vlog2.f32 %v278_v23 }
  0x65   : > { %v520_v29 = vpop.eup %519 }
  0x66   : > { %v287_v31 = vmul.f32 %v520_v29, %v281_v28  ;;  %v522_v35 = vpop.eup %521 }
  0x67   : > { %v284_v39 = vmul.f32 0.6931472, %v522_v35 }
  0x68   : > { %v288_v33 = vsub.f32 1.0, %v287_v31  ;;  %vm292_vm4 = vcmp.lt.f32.partialorder %v287_v31, 0.2  ;;  %vm291_vm5 = vcmp.ge.f32.partialorder %v287_v31, 0.5 }
  0x69   : > { %v285_v42 = vsub.f32 %v282_v38, %v284_v39 }
  0x6a   : > { %v289_v34 = vmul.f32 %v288_v33, %v288_v33 }
  0x6c   : > { %v290_v37 = vmul.f32 %v289_v34, %v288_v33 }
  0x6e   : > { %v293_v40 = vmul.f32 %v290_v37, %v288_v33 }
  0x70   : > { %v294_v41 = vmul.f32 %v293_v40, %v288_v33 }
  0x72   : > { %v295_v43 = vsel %vm292_vm4, %v294_v41, %v290_v37 }
  0x73   : > { %v296_v44 = vsel %vm291_vm5, 1.0, %v295_v43 }
  0x74   : > { %v297_v45 = vsub.f32 0.0, %v296_v44 }
  0x76   : > { %v298_v47 = vmul.f32 %v297_v45, %v285_v42 }
  0x78   : > { %v300_v48 = vadd.f32 %v299_v46, %v298_v47 }
  0x7a   : > { %301 = vst [vmem:[#allocation2] sm:$0x3] %v300_v48 }
  0x81   : > { %v305_v49 = vld [vmem:[#allocation2] sm:$0x3] }
  0x82   : > { %v307_v50 = vsel %vm306_vm6, %v305_v49, 0.0 }
  0x83   : > { %308 = vadd.xlane.f32.xlu0 %v307_v50 }
 0x10c   : > { %v309_v51 = vpop.xlane.xlu0 %308 }
 0x10d   : > { %v310_v52 = vrot.slane %v309_v51, 4 }
 0x10f   : > { %v311_v53 = vadd.f32 %v310_v52, %v309_v51 }
 0x111   : > { %v312_v54 = vrot.slane %v311_v53, 2 }
 0x113   : > { %v313_v55 = vadd.f32 %v312_v54, %v311_v53 }
 0x115   : > { %v314_v56 = vrot.slane %v313_v55, 1 }
 0x117   : > { %v315_v57 = vadd.f32 %v314_v56, %v313_v55 }
 0x119   : > { %446 = vpush %v315_v57 }
 0x14a   : > { %s447_s18 = spop %446 }
 0x14b   : > { %v317_v58 = vstv %s447_s18 }
 0x14c   : > { %319 = vst.msk [vmem:[%s237_s17] sm:$0x1] %vm318_vm7, %v317_v58 }
 0x14d PF: > { %s18_s14 = sadd.s32 1, %s633_s14   ;;  %s786_s9 = smov %s617_s10 }
 0x14e   : > { %p15_p9 = scmp.ge.s32.totalorder %s18_s14, 4   ;;  %s787_s10 = smov %s621_s11 }
 0x14f   : > { %s788_s11 = smov %s704_s21  ;;  %s789_s12 = smov %s629_s13 }
 0x150   : > { %s790_s13 = smov %s792_s16  ;;  %17 = sbr.rel (!%p15_p9) target bundleno = 6 (0x6), region = 92 }
 0x155   :  { %343 = vsyncpa [#allocation4], 1 }
 0x156   :  { %345 = vsyncpa [#allocation4 + $0x1], 1 }
 0x157   :  { %346 = vsyncpa [#allocation6], 1 }
 0x158   :  { %348 = vsyncpa [#allocation6 + $0x1], 1 }

</bundles_post_ra>
